<compile_context>
chip_gen: v6e
topology: v6e:2x2x1
jax: 0.10.0
libtpu: 0.0.40
codegen_flags: <defaults>
</compile_context>

<pallas_src>
import jax
import jax.numpy as jnp
from jax.experimental import pallas as pl
from jax.experimental.pallas import tpu as pltpu


def _relu(h):
    return jnp.maximum(h, 0.0)


def _round_up(n, m):
    return ((n + m - 1) // m) * m


def _make_kernel(non_linearity):
    def kernel(x_ref, w1_ref, b1_ref, w2_ref, o_ref):
        # hidden = non_linear(x @ W1 + b1), accumulated in f32 on the MXU.
        h = jnp.dot(x_ref[...], w1_ref[...], preferred_element_type=jnp.float32)
        h = non_linearity(h + b1_ref[...])          # (TB, H) + (1, H), f32 VPU path
        # out = hidden @ W2 (no bias); cast h to the weight dtype (bf16 fast path
        # on v6e/v7x, no-op for f32) and accumulate in f32 again.
        out = jnp.dot(h.astype(w2_ref.dtype), w2_ref[...],
                      preferred_element_type=jnp.float32)
        o_ref[...] = out.astype(o_ref.dtype)
    return kernel


def random_network_forward(x, w1, b1, w2, *,
                           non_linearity=_relu,
                           compute_dtype=None,
                           tile_b=128):
    """Fused RandomNetwork forward.

    x:  (B, D_in)
    w1: (H, D_in)    -- PyTorch nn.Linear(input_dim, hidden_dim).weight layout
    b1: (H,)
    w2: (D_out, H)   -- nn.Linear(hidden_dim, output_dim, bias=False).weight
    """
    out_dtype = x.dtype
    B, D_in = x.shape
    H = w1.shape[0]
    D_out = w2.shape[0]

    # Pre-transpose so both matmuls in the kernel are plain `x @ W` (lane-dense,
    # MXU friendly).  Bias becomes a 2-D (1, H) f32 tile.
    w1_t = jnp.transpose(w1)                       # (D_in, H)
    w2_t = jnp.transpose(w2)                       # (H, D_out)
    b1_2d = b1.astype(jnp.float32).reshape(1, H)

    if compute_dtype is not None:
        x = x.astype(compute_dtype)
        w1_t = w1_t.astype(compute_dtype)
        w2_t = w2_t.astype(compute_dtype)

    # Batch tile: multiple of 8 sublanes, capped at 128; pad B to whole tiles.
    TB = min(tile_b, _round_up(B, 8))
    B_pad = _round_up(B, TB)
    if B_pad != B:
        x = jnp.pad(x, ((0, B_pad - B), (0, 0)))

    # Lane-dense output: pad D_out to a multiple of 128 (unmasked vector stores).
    D_out_pad = _round_up(D_out, 128)
    if D_out_pad != D_out:
        w2_t = jnp.pad(w2_t, ((0, 0), (0, D_out_pad - D_out)))

    grid = (B_pad // TB,)

    x_item = jnp.dtype(x.dtype).itemsize
    w_item = jnp.dtype(w1_t.dtype).itemsize
    # Rough VMEM budget: double-buffered x / out tiles + weights + bias.
    vmem_needed = (2 * (TB * D_in * x_item + TB * D_out_pad * 4)
                   + 2 * (D_in * H + H * D_out_pad) * w_item
                   + 2 * H * 4)
    vmem_limit = int(min(64 * 1024 * 1024, max(32 * 1024 * 1024, 2 * vmem_needed)))

    flops = 2 * B_pad * (D_in * H + H * D_out_pad)
    bytes_accessed = (B_pad * D_in * x_item
                      + (D_in * H + H * D_out_pad) * w_item
                      + H * 4
                      + B_pad * D_out_pad * jnp.dtype(out_dtype).itemsize)

    out = pl.pallas_call(
        _make_kernel(non_linearity),
        out_shape=jax.ShapeDtypeStruct((B_pad, D_out_pad), out_dtype),
        grid_spec=pltpu.PrefetchScalarGridSpec(
            num_scalar_prefetch=0,
            grid=grid,
            in_specs=[
                pl.BlockSpec((TB, D_in), lambda i: (i, 0)),        # streamed
                pl.BlockSpec((D_in, H), lambda i: (0, 0)),         # resident
                pl.BlockSpec((1, H), lambda i: (0, 0)),            # resident
                pl.BlockSpec((H, D_out_pad), lambda i: (0, 0)),    # resident
            ],
            out_specs=pl.BlockSpec((TB, D_out_pad), lambda i: (i, 0)),
        ),
        compiler_params=pltpu.CompilerParams(
            dimension_semantics=("parallel",),
            vmem_limit_bytes=vmem_limit,
        ),
        cost_estimate=pl.CostEstimate(
            flops=flops, transcendentals=0, bytes_accessed=bytes_accessed),
    )(x, w1_t, b1_2d, w2_t)

    out = out[:B, :D_out]
    # .detach() in the PyTorch forward == stop_gradient (pure glue).
    return jax.lax.stop_gradient(out)


if __name__ == "__main__":
    # Shapes implied by the module: flat feature vectors; batch chosen so the
    # batch-tiled grid actually has >1 step (TB=128 -> grid=(2,)).
    batch, input_dim, hidden_dim, output_dim = 256, 16, 32, 8

    key = jax.random.PRNGKey(0)
    kx, kw1, kb1, kw2 = jax.random.split(key, 4)

    x = jax.random.normal(kx, (batch, input_dim), dtype=jnp.float32)
    # Deterministic "random network" parameters in PyTorch Linear layout.
    w1 = jax.random.normal(kw1, (hidden_dim, input_dim), dtype=jnp.float32) * 0.1
    b1 = jax.random.normal(kb1, (hidden_dim,), dtype=jnp.float32) * 0.1
    w2 = jax.random.normal(kw2, (output_dim, hidden_dim), dtype=jnp.float32) * 0.1

    # Pure-JAX reference of the PyTorch forward (ReLU non-linearity).
    ref = jnp.maximum(x @ w1.T + b1, 0.0) @ w2.T

    # f32 path: bit-accurate vs the reference.
    out = jax.block_until_ready(random_network_forward(x, w1, b1, w2))
    assert out.shape == (batch, output_dim)
    assert jnp.allclose(out, ref, atol=1e-5, rtol=1e-5)

    # bf16 weights/activations with f32 accumulation (v6e/v7x MXU fast path).
    out_bf16 = jax.block_until_ready(
        random_network_forward(x, w1, b1, w2, compute_dtype=jnp.bfloat16))
    assert out_bf16.shape == (batch, output_dim)
    assert jnp.allclose(out_bf16, ref, atol=5e-2, rtol=5e-2)

    print("KERNEL_OK")
</pallas_src>

<mosaic_0001>
module attributes {stable_mosaic.version = 11 : i64} {
  func.func @kernel(%arg0: i32, %arg1: memref<128x16xf32, #tpu.memory_space<vmem>>, %arg2: memref<16x32xf32, #tpu.memory_space<vmem>>, %arg3: memref<1x32xf32, #tpu.memory_space<vmem>>, %arg4: memref<32x128xf32, #tpu.memory_space<vmem>>, %arg5: memref<128x128xf32, #tpu.memory_space<vmem>>) attributes {dimension_semantics = [#tpu.dimension_semantics<parallel>], iteration_bounds = array<i64: 2>, scalar_prefetch = 0 : i64, scratch_operands = 0 : i64, tpu.core_type = #tpu.core_type<tc>, window_params = [{transform_indices = @transform_0, window_bounds = array<i64: 128, 16>}, {pipeline_mode = #tpu.pipeline_mode<synchronous>, transform_indices = @transform_1, window_bounds = array<i64: 16, 32>}, {pipeline_mode = #tpu.pipeline_mode<synchronous>, transform_indices = @transform_2, window_bounds = array<i64: 1, 32>}, {pipeline_mode = #tpu.pipeline_mode<synchronous>, transform_indices = @transform_3, window_bounds = array<i64: 32, 128>}, {transform_indices = @transform_4, window_bounds = array<i64: 128, 128>}]} {
    %c0 = arith.constant 0 : index
    %c0_0 = arith.constant 0 : index
    %0 = vector.load %arg1[%c0, %c0_0] : memref<128x16xf32, #tpu.memory_space<vmem>>, vector<128x16xf32>
    %c0_1 = arith.constant 0 : index
    %c0_2 = arith.constant 0 : index
    %1 = vector.load %arg2[%c0_1, %c0_2] : memref<16x32xf32, #tpu.memory_space<vmem>>, vector<16x32xf32>
    %cst = arith.constant dense<0.000000e+00> : vector<128x32xf32>
    %2 = tpu.matmul %0, %1, %cst {dimension_numbers = #tpu.dot_dimension_numbers<[1], [0], [0], [1], [0, 0, 1, 1], [], []>} : vector<128x16xf32>, vector<16x32xf32>, vector<128x32xf32> -> vector<128x32xf32>
    %c0_3 = arith.constant 0 : index
    %c0_4 = arith.constant 0 : index
    %3 = vector.load %arg3[%c0_3, %c0_4] : memref<1x32xf32, #tpu.memory_space<vmem>>, vector<1x32xf32>
    %4 = vector.broadcast %3 : vector<1x32xf32> to vector<128x32xf32>
    %5 = arith.addf %2, %4 : vector<128x32xf32>
    %cst_5 = arith.constant 0.000000e+00 : f32
    %6 = vector.broadcast %cst_5 : f32 to vector<128x32xf32>
    %7 = arith.maximumf %5, %6 : vector<128x32xf32>
    %c0_6 = arith.constant 0 : index
    %c0_7 = arith.constant 0 : index
    %8 = vector.load %arg4[%c0_6, %c0_7] : memref<32x128xf32, #tpu.memory_space<vmem>>, vector<32x128xf32>
    %cst_8 = arith.constant dense<0.000000e+00> : vector<128x128xf32>
    %9 = tpu.matmul %7, %8, %cst_8 {dimension_numbers = #tpu.dot_dimension_numbers<[1], [0], [0], [1], [0, 0, 1, 1], [], []>} : vector<128x32xf32>, vector<32x128xf32>, vector<128x128xf32> -> vector<128x128xf32>
    %c0_9 = arith.constant 0 : index
    %c0_10 = arith.constant 0 : index
    %10 = vector.load %arg5[%c0_9, %c0_10] : memref<128x128xf32, #tpu.memory_space<vmem>>, vector<128x128xf32>
    tpu.vector_store %arg5[%c0_9, %c0_10], %9 {strides = array<i32>} : memref<128x128xf32, #tpu.memory_space<vmem>>, vector<128x128xf32>,
    return
  }
  func.func @transform_0(%arg0: i32) -> (i32, i32) {
    %c0_i32 = arith.constant 0 : i32
    %c0_i32_0 = arith.constant 0 : i32
    return %arg0, %c0_i32 : i32, i32
  }
  func.func @transform_1(%arg0: i32) -> (i32, i32) {
    %c0_i32 = arith.constant 0 : i32
    %c0_i32_0 = arith.constant 0 : i32
    %c0_i32_1 = arith.constant 0 : i32
    return %c0_i32, %c0_i32_0 : i32, i32
  }
  func.func @transform_2(%arg0: i32) -> (i32, i32) {
    %c0_i32 = arith.constant 0 : i32
    %c0_i32_0 = arith.constant 0 : i32
    %c0_i32_1 = arith.constant 0 : i32
    return %c0_i32, %c0_i32_0 : i32, i32
  }
  func.func @transform_3(%arg0: i32) -> (i32, i32) {
    %c0_i32 = arith.constant 0 : i32
    %c0_i32_0 = arith.constant 0 : i32
    %c0_i32_1 = arith.constant 0 : i32
    return %c0_i32, %c0_i32_0 : i32, i32
  }
  func.func @transform_4(%arg0: i32) -> (i32, i32) {
    %c0_i32 = arith.constant 0 : i32
    %c0_i32_0 = arith.constant 0 : i32
    return %arg0, %c0_i32 : i32, i32
  }
}

</mosaic_0001>

<bundles_post_ra>
// kernel: tpu_custom_call.1
= control target key start
LH: loop header
LB: loop body
LE: loop exit
PB: predicated region body
PF: predicated region fallthrough
CT: control target
= control target key end

     0   :  { %9 = vsyncpa [#allocation3], 0  ;;  %s1194_s0 = inlined_call_operand.vmem [shape: f32[256,16], index: 0, kind: input, shape index: {}]   ;;  %s1195_s1 = inlined_call_operand.vmem [shape: f32[16,32], index: 1, kind: input, shape index: {}]   ;;  %s1196_s2 = inlined_call_operand.vmem [shape: f32[1,32], index: 2, kind: input, shape index: {}]   ;;  %s1197_s3 = inlined_call_operand.vmem [shape: f32[32,128], index: 3, kind: input, shape index: {}]   ;;  %s1198_s4 = inlined_call_operand.hbm [shape: f32[256,128], index: 4, kind: output, shape index: {}]  }
   0x1   :  { %11 = vsyncpa [#allocation3 + $0x1], 0  ;;  %s999_s15 = smov 0   ;;  %s1001_s16 = smov 0  }
   0x2   :  { %s1003_s17 = smov 0   ;;  %s1005_s18 = smov 0  }
   0x3 LB: > { %s1020_s19 = sadd.s32 4294967295, %s969_s18   ;;  %s724_s20 = sadd.s32 4294967294, %s969_s18   ;;  %s969_s18 = sphi %s1005_s18, %s1204_s18   ;;  %s965_s17 = sphi %s1003_s17, %s1203_s17   ;;  %s961_s16 = sphi %s1001_s16, %s1202_s16   ;;  %s957_s15 = sphi %s999_s15, %s1201_s15  }
   0x4   : > { %s1024_s21 = sadd.s32 1, %s969_s18   ;;  %s113_s22 = sadd.s32 1, %s965_s17 }
   0x5   : > { %s110_s23 = ssub.s32 %s969_s18, %s1024_s21  ;;  %p123_p0 = scmp.ne.s32.totalorder %s965_s17, %s961_s16 }
   0x6   : > { %p111_p1 = scmp.eq.s32.totalorder %s110_s23, 0  ;;  %p124_p2 = scmp.eq.s32.totalorder %s1020_s19, 1 }
   0x7   : > { %p129_p3 = scmp.ne.s32.totalorder %s961_s16, %s957_s15  ;;  %p130_p4 = scmp.eq.s32.totalorder %s724_s20, 1 }
   0x8   : > { %s1035_s24 = scalar_select %p111_p1, %s965_s17, %s113_s22  }
   0x9   : > { %p1037_p5 = por %p124_p2, %p123_p0  ;;  %p1041_p6 = por %p130_p4, %p129_p3 }
   0xa   : > { %p727_p7 = scmp.ge.s32.totalorder %s969_s18, 1  ;;  %p166_p8 = scmp.lt.s32.totalorder %s969_s18, 3 }
   0xc   : > { %p167_p9 = pnand %p727_p7, %p166_p8 }
   0xd   : > { %s729_s5 = sshll.u32 (!%p167_p9), %s1020_s19, 4  ;;  %s189_s29 = sand.u32 (!%p167_p9), 1, %s961_s16  }
   0xe   : > { %170 = sbr.rel (%p167_p9) target bundleno = 461 (0x1cd), region = 36  ;;  %p193_p10 = scmp.lt.s32.totalorder (!%p167_p9), %s729_s5, 31 }
   0xf   : > { %s728_s30 = sshll.u32 (!%p167_p9), %s189_s29, 7  ;;  %s1154_s11 = scalar_lea.sflag (!%p167_p9), [#allocation3], %s189_s29 }
  0x10   : > { %s971_s12 = smov (!%p167_p9), [#allocation2]  }
  0x11   : > { %s913_s13 = sshll.u32 (!%p167_p9), %s971_s12, 4  ;;  %s914_s13 = int_to_ptr.vmem [resolvable:$false] %s913_s13 }
  0x12   : > { %s915_s14 = scalar_lea.vmem (!%p167_p9), %s914_s13, 4096 }
  0x13   : > { %v216_v0 = vld [vmem:[%s1195_s1 + $0x8] sm:$0xff]  ;;  %v215_v1 = vld [vmem:[%s1195_s1] sm:$0xff]  ;;  %s1206_s5 = smov (!%p193_p10, %s729_s5), 31  ;;  %vm224_vm0 = vcmask 130048   ;;  %v437_v18 = vld [vmem:[%s1197_s3 + $0x18] sm:$0xff]  ;;  %vm438_vm1 = vcmask 261120  }
  0x14   : > { %808 = vmatprep.subr.mxu0 %v216_v0  ;;  %s730_s6 = sshll.u32 %s1206_s5, 3  ;;  %836 = vmatprep.subr.mxu1 %v437_v18  ;;  %v436_v19 = vld [vmem:[%s1197_s3 + $0x10] sm:$0xff]  ;;  %v435_v20 = vld [vmem:[%s1197_s3 + $0x8] sm:$0xff]  ;;  %v434_v21 = vld [vmem:[%s1197_s3] sm:$0xff]  ;;  %s1125_s5 = scalar_lea.vmem [#allocation2], %s728_s30 }
  0x15   : > { %809 = vmatpush3.msra.mxu0 %v216_v0  ;;  %s1057_s9 = scalar_lea.vmem %s1194_s0, %s730_s6  ;;  %837 = vmatpush3.msra.mxu1 %v437_v18  ;;  %v731_v22 = vld [vmem:[%s1196_s2] ss:$0 sm:$0xff]  ;;  %s769_s6 = sshll.u32 %s1020_s19, 11 }
  0x16   : > { %810 = vmatprep.subr.mxu0 %v215_v1  ;;  %v199_v2 = vld [vmem:[%s1057_s9] sm:$0xff]  ;;  %v200_v3 = vld [vmem:[%s1057_s9 + $0x8] sm:$0xff]  ;;  %v201_v4 = vld [vmem:[%s1057_s9 + $0x10] sm:$0xff]  ;;  %838 = vmatprep.subr.mxu1 %v436_v19  ;;  %s662_s7 = sshll.u32 %s1125_s5, 4  ;;  %s1146_s10 = scalar_lea.hbm %s1198_s4, %s769_s6  ;;  %s1148_s7 = int_to_ptr.vmem [resolvable:$true] %s662_s7 }
  0x17   : > { %811 = vmatpush3.msra.mxu0 %v215_v1  ;;  %812 = vmatprep.mubr.msk.f32.mxu0 %vm224_vm0, %v199_v2  ;;  %v202_v5 = vld [vmem:[%s1057_s9 + $0x18] sm:$0xff]  ;;  %v203_v6 = vld [vmem:[%s1057_s9 + $0x20] sm:$0xff]  ;;  %v204_v7 = vld [vmem:[%s1057_s9 + $0x28] sm:$0xff]  ;;  %s909_s19 = scalar_lea.vmem %s1148_s7, 2048  ;;  %p916_p0 = scmp.lt.s32.totalorder %s1148_s7, %s914_s13 }
  0x18   : > { %813 = vmatmul.mubr.msk.f32.vlgmr.msra.gmra.mxu0 %vm224_vm0, %v200_v3  ;;  %v205_v8 = vld [vmem:[%s1057_s9 + $0x30] sm:$0xff]  ;;  %v206_v9 = vld [vmem:[%s1057_s9 + $0x38] sm:$0xff]  ;;  %v207_v10 = vld [vmem:[%s1057_s9 + $0x40] sm:$0xff]  ;;  %839 = vmatpush3.msra.mxu1 %v436_v19  ;;  %p910_p11 = scmp.ne.s32.totalorder %s1148_s7, %s909_s19  ;;  %p917_p1 = scmp.lt.s32.totalorder %s915_s14, %s909_s19 }
  0x19   : > { %815 = vmatprep.mubr.msk.f32.mxu0 %vm224_vm0, %v201_v4  ;;  %v208_v11 = vld [vmem:[%s1057_s9 + $0x48] sm:$0xff]  ;;  %v209_v12 = vld [vmem:[%s1057_s9 + $0x50] sm:$0xff]  ;;  %v210_v13 = vld [vmem:[%s1057_s9 + $0x58] sm:$0xff]  ;;  %840 = vmatprep.subr.mxu1 %v435_v20 }
  0x1a   : > { %v211_v14 = vld [vmem:[%s1057_s9 + $0x60] sm:$0xff]  ;;  %v212_v15 = vld [vmem:[%s1057_s9 + $0x68] sm:$0xff]  ;;  %v213_v16 = vld [vmem:[%s1057_s9 + $0x70] sm:$0xff]  ;;  %841 = vmatpush3.msra.mxu1 %v435_v20  ;;  %p911_p12 = pnand %p910_p11, %p1037_p5  ;;  %p918_p2 = por %p917_p1, %p916_p0 }
  0x1b   : > { %v214_v17 = vld [vmem:[%s1057_s9 + $0x78] sm:$0xff]  ;;  %842 = vmatprep.subr.mxu1 %v434_v21 }
  0x1c   : > { %816 = vmatmul.mubr.msk.f32.gmra.mxu0 %vm224_vm0, %v202_v5  ;;  %843 = vmatpush3.msra.mxu1 %v434_v21  ;;  %p912_p13 = pneg %p911_p12 }
  0x1d   : > { %818 = vmatprep.mubr.msk.f32.mxu0 %vm224_vm0, %v203_v6 }
  0x1e   : > { %p919_p3 = pnand %p918_p2, %p912_p13 }
  0x20   : > { %819 = vmatmul.mubr.msk.f32.gmra.mxu0 %vm224_vm0, %v204_v7 }
  0x21   : > { %821 = vmatprep.mubr.msk.f32.mxu0 %vm224_vm0, %v205_v8 }
  0x24   : > { %822 = vmatmul.mubr.msk.f32.gmra.mxu0 %vm224_vm0, %v206_v9 }
  0x25   : > { %824 = vmatprep.mubr.msk.f32.mxu0 %vm224_vm0, %v207_v10 }
  0x28   : > { %825 = vmatmul.mubr.msk.f32.gmra.mxu0 %vm224_vm0, %v208_v11 }
  0x29   : > { %827 = vmatprep.mubr.msk.f32.mxu0 %vm224_vm0, %v209_v12 }
  0x2c   : > { %828 = vmatmul.mubr.msk.f32.gmra.mxu0 %vm224_vm0, %v210_v13 }
  0x2d   : > { %830 = vmatprep.mubr.msk.f32.mxu0 %vm224_vm0, %v211_v14 }
  0x30   : > { %831 = vmatmul.mubr.msk.f32.gmra.mxu0 %vm224_vm0, %v212_v15 }
  0x31   : > { %833 = vmatprep.mubr.msk.f32.mxu0 %vm224_vm0, %v213_v16 }
  0x34   : > { %834 = vmatmul.mubr.msk.f32.gmra.mxu0 %vm224_vm0, %v214_v17 }
  0xd8   : > { %v814_v23 = vpop.f32.mrf.mxu0 }
  0xd9   : > { %v345_v24 = vadd.f32 %v814_v23, %v731_v22 }
  0xda   : > { %v339_v25 = vpop.f32.mrf.mxu0 }
  0xdb   : > { %v340_v26 = vadd.f32 %v731_v22, %v339_v25  ;;  %v419_v29 = vmax.f32 %v345_v24, 0.0 }
  0xdc   : > { %v817_v27 = vpop.f32.mrf.mxu0 }
  0xdd   : > { %v418_v28 = vmax.f32 %v340_v26, 0.0  ;;  %v355_v30 = vadd.f32 %v817_v27, %v731_v22 }
  0xde   : > { %v349_v31 = vpop.f32.mrf.mxu0 }
  0xdf   : > { %v350_v32 = vadd.f32 %v731_v22, %v349_v31  ;;  %844 = vmatprep.mubr.msk.f32.mxu1 %vm438_vm1, %v418_v28  ;;  %v421_v35 = vmax.f32 %v355_v30, 0.0 }
  0xe0   : > { %v820_v33 = vpop.f32.mrf.mxu0  ;;  %845 = vmatmul.mubr.msk.f32.vlgmr.msra.gmra.mxu1 %vm438_vm1, %v419_v29 }
  0xe1   : > { %v420_v34 = vmax.f32 %v350_v32, 0.0  ;;  %v365_v36 = vadd.f32 %v820_v33, %v731_v22 }
  0xe2   : > { %v359_v37 = vpop.f32.mrf.mxu0 }
  0xe3   : > { %v360_v38 = vadd.f32 %v731_v22, %v359_v37  ;;  %847 = vmatprep.mubr.msk.f32.mxu1 %vm438_vm1, %v420_v34  ;;  %v423_v41 = vmax.f32 %v365_v36, 0.0 }
  0xe4   : > { %v823_v39 = vpop.f32.mrf.mxu0  ;;  %848 = vmatmul.mubr.msk.f32.gmra.mxu1 %vm438_vm1, %v421_v35 }
  0xe5   : > { %v422_v40 = vmax.f32 %v360_v38, 0.0  ;;  %v375_v42 = vadd.f32 %v823_v39, %v731_v22 }
  0xe6   : > { %v369_v43 = vpop.f32.mrf.mxu0 }
  0xe7   : > { %v370_v44 = vadd.f32 %v731_v22, %v369_v43  ;;  %850 = vmatprep.mubr.msk.f32.mxu1 %vm438_vm1, %v422_v40  ;;  %v425_v47 = vmax.f32 %v375_v42, 0.0 }
  0xe8   : > { %v826_v45 = vpop.f32.mrf.mxu0  ;;  %851 = vmatmul.mubr.msk.f32.gmra.mxu1 %vm438_vm1, %v423_v41 }
  0xe9   : > { %v424_v46 = vmax.f32 %v370_v44, 0.0  ;;  %v385_v48 = vadd.f32 %v826_v45, %v731_v22 }
  0xea   : > { %v379_v49 = vpop.f32.mrf.mxu0 }
  0xeb   : > { %v380_v50 = vadd.f32 %v731_v22, %v379_v49  ;;  %853 = vmatprep.mubr.msk.f32.mxu1 %vm438_vm1, %v424_v46  ;;  %v427_v53 = vmax.f32 %v385_v48, 0.0 }
  0xec   : > { %v829_v51 = vpop.f32.mrf.mxu0  ;;  %854 = vmatmul.mubr.msk.f32.gmra.mxu1 %vm438_vm1, %v425_v47 }
  0xed   : > { %v426_v52 = vmax.f32 %v380_v50, 0.0  ;;  %v395_v54 = vadd.f32 %v829_v51, %v731_v22 }
  0xee   : > { %v389_v55 = vpop.f32.mrf.mxu0 }
  0xef   : > { %v390_v56 = vadd.f32 %v731_v22, %v389_v55  ;;  %856 = vmatprep.mubr.msk.f32.mxu1 %vm438_vm1, %v426_v52  ;;  %v429_v59 = vmax.f32 %v395_v54, 0.0 }
  0xf0   : > { %v832_v57 = vpop.f32.mrf.mxu0  ;;  %857 = vmatmul.mubr.msk.f32.gmra.mxu1 %vm438_vm1, %v427_v53 }
  0xf1   : > { %v428_v58 = vmax.f32 %v390_v56, 0.0  ;;  %v405_v60 = vadd.f32 %v832_v57, %v731_v22 }
  0xf2   : > { %v399_v61 = vpop.f32.mrf.mxu0 }
  0xf3   : > { %v400_v62 = vadd.f32 %v731_v22, %v399_v61  ;;  %859 = vmatprep.mubr.msk.f32.mxu1 %vm438_vm1, %v428_v58  ;;  %v431_v1 = vmax.f32 %v405_v60, 0.0 }
  0xf4   : > { %v835_v63 = vpop.f32.mrf.mxu0  ;;  %860 = vmatmul.mubr.msk.f32.gmra.mxu1 %vm438_vm1, %v429_v59 }
  0xf5   : > { %v430_v0 = vmax.f32 %v400_v62, 0.0  ;;  %v415_v2 = vadd.f32 %v835_v63, %v731_v22 }
  0xf6   : > { %v409_v3 = vpop.f32.mrf.mxu0 }
  0xf7   : > { %v410_v4 = vadd.f32 %v731_v22, %v409_v3  ;;  %862 = vmatprep.mubr.msk.f32.mxu1 %vm438_vm1, %v430_v0  ;;  %v433_v6 = vmax.f32 %v415_v2, 0.0 }
  0xf8   : > { %863 = vmatmul.mubr.msk.f32.gmra.mxu1 %vm438_vm1, %v431_v1 }
  0xf9   : > { %v432_v5 = vmax.f32 %v410_v4, 0.0 }
  0xfb   : > { %865 = vmatprep.mubr.msk.f32.mxu1 %vm438_vm1, %v432_v5 }
  0xfc   : > { %866 = vmatmul.mubr.msk.f32.gmra.mxu1 %vm438_vm1, %v433_v6 }
 0x1a0   : > { %v846_v7 = vpop.f32.mrf.mxu1 }
 0x1a1   : > { %633 = vst [vmem:[%s1125_s5 + $0x8] sm:$0xff] %v846_v7 }
 0x1a2   : > { %v553_v8 = vpop.f32.mrf.mxu1 }
 0x1a3   : > { %632 = vst [vmem:[%s1125_s5] sm:$0xff] %v553_v8 }
 0x1a4   : > { %v849_v9 = vpop.f32.mrf.mxu1 }
 0x1a5   : > { %635 = vst [vmem:[%s1125_s5 + $0x18] sm:$0xff] %v849_v9 }
 0x1a6   : > { %v563_v10 = vpop.f32.mrf.mxu1 }
 0x1a7   : > { %634 = vst [vmem:[%s1125_s5 + $0x10] sm:$0xff] %v563_v10 }
 0x1a8   : > { %v852_v11 = vpop.f32.mrf.mxu1 }
 0x1a9   : > { %637 = vst [vmem:[%s1125_s5 + $0x28] sm:$0xff] %v852_v11 }
 0x1aa   : > { %v573_v12 = vpop.f32.mrf.mxu1 }
 0x1ab   : > { %636 = vst [vmem:[%s1125_s5 + $0x20] sm:$0xff] %v573_v12 }
 0x1ac   : > { %v855_v13 = vpop.f32.mrf.mxu1 }
 0x1ad   : > { %639 = vst [vmem:[%s1125_s5 + $0x38] sm:$0xff] %v855_v13 }
 0x1ae   : > { %v583_v14 = vpop.f32.mrf.mxu1 }
 0x1af   : > { %638 = vst [vmem:[%s1125_s5 + $0x30] sm:$0xff] %v583_v14 }
 0x1b0   : > { %v858_v15 = vpop.f32.mrf.mxu1 }
 0x1b1   : > { %641 = vst [vmem:[%s1125_s5 + $0x48] sm:$0xff] %v858_v15 }
 0x1b2   : > { %v593_v16 = vpop.f32.mrf.mxu1 }
 0x1b3   : > { %640 = vst [vmem:[%s1125_s5 + $0x40] sm:$0xff] %v593_v16 }
 0x1b4   : > { %v861_v17 = vpop.f32.mrf.mxu1 }
 0x1b5   : > { %643 = vst [vmem:[%s1125_s5 + $0x58] sm:$0xff] %v861_v17 }
 0x1b6   : > { %v603_v18 = vpop.f32.mrf.mxu1 }
 0x1b7   : > { %642 = vst [vmem:[%s1125_s5 + $0x50] sm:$0xff] %v603_v18 }
 0x1b8   : > { %v864_v19 = vpop.f32.mrf.mxu1 }
 0x1b9   : > { %645 = vst [vmem:[%s1125_s5 + $0x68] sm:$0xff] %v864_v19 }
 0x1ba   : > { %v613_v20 = vpop.f32.mrf.mxu1 }
 0x1bb   : > { %644 = vst [vmem:[%s1125_s5 + $0x60] sm:$0xff] %v613_v20 }
 0x1bc   : > { %v867_v21 = vpop.f32.mrf.mxu1 }
 0x1bd   : > { %647 = vst [vmem:[%s1125_s5 + $0x78] sm:$0xff] %v867_v21 }
 0x1be   : > { %v623_v22 = vpop.f32.mrf.mxu1 }
 0x1bf   : > { %646 = vst [vmem:[%s1125_s5 + $0x70] sm:$0xff] %v623_v22 }
 0x1c0   : > { %922 = shalt.err (!%p919_p3)
}
 0x1c1   : > { %s923_s20 = scalar_lea.hbm %s1146_s10, 2048  ;;  %s927_s27 = scalar_lea.hbm %s1198_s4, 4096 }
 0x1c2   : > { %p924_p4 = scmp.ne.s32.totalorder %s1146_s10, %s923_s20  ;;  %p928_p9 = scmp.lt.s32.totalorder %s1146_s10, %s1198_s4 }
 0x1c3   : > { %p929_p10 = scmp.lt.s32.totalorder %s927_s27, %s923_s20 }
 0x1c4   : > { %p925_p7 = pnand %p924_p4, %p1037_p5 }
 0x1c5   : > { %p930_p11 = por %p929_p10, %p928_p9 }
 0x1c6   : > { %p926_p8 = pneg %p925_p7 }
 0x1c8   : > { %p931_p12 = pnand %p930_p11, %p926_p8 }
 0x1ca   : > { %934 = shalt.err (!%p931_p12)
}
 0x1cb   : > { %s972_s30 = smov 128   ;;  %s973_s5 = smov 8  }
 0x1cc   : > { %868 = dma.vmem_to_hbm [thread:$0]  (%p1037_p5), %s1148_s7, 2048, %s1146_s10, %s1154_s11, %s972_s30, %s972_s30, %s973_s5  }
 0x1cd PF: > { %p874_p13 = scmp.ge.s32.totalorder %s969_s18, 2  ;;  %s677_s6 = sand.u32 1, %s957_s15  }
 0x1ce   : > { %s678_s8 = scalar_lea.sflag [#allocation3], %s677_s6 }
 0x1cf   : > { %p871_p0 = pnand %p874_p13, %p1041_p6 }
 0x1d1   : > { %p872_p1 = pneg %p871_p0 }
 0x1d3   : > { %952 = dma.done.wait (%p872_p1), %s678_s8, 2048  }
 0x1d4   : > { %954 = vsyncadd (%p872_p1), %s678_s8, 4294965248  ;;  %p14_p2 = scmp.ge.s32.totalorder %s1024_s21, 4   ;;  %s1201_s15 = smov %s961_s16 }
 0x1d5   : > { %s1202_s16 = smov %s965_s17  ;;  %s1203_s17 = smov %s1035_s24 }
 0x1d6   : > { %s1204_s18 = smov %s1024_s21  ;;  %16 = sbr.rel (!%p14_p2) target bundleno = 3 (0x3), region = 71 }
 0x1db   :  { %683 = vsyncpa [#allocation3], 1 }
 0x1dc   :  { %685 = vsyncpa [#allocation3 + $0x1], 1 }

</bundles_post_ra>
